<compile_context>
chip_gen: v6e
topology: v6e:2x2x1
jax: 0.10.0
libtpu: 0.0.40
codegen_flags: <defaults>
</compile_context>

<pallas_src>
import jax
import jax.numpy as jnp
import numpy as np
from jax.experimental import pallas as pl
from jax.experimental.pallas import tpu as pltpu


# ---------------------------------------------------------------------------
# Beta schedule (host-side numpy, same math as make_beta_schedule('linear')).
# ---------------------------------------------------------------------------
def make_linear_schedule(n_timestep, linear_start=1e-4, linear_end=2e-2):
    betas = np.linspace(linear_start, linear_end, n_timestep, dtype=np.float64)
    alphas = 1.0 - betas
    alphas_cumprod = np.cumprod(alphas, axis=0)
    sqrt_alphas_cumprod_prev = np.sqrt(np.append(1.0, alphas_cumprod))
    return betas, alphas_cumprod, sqrt_alphas_cumprod_prev


def _round_up(x, m):
    return ((x + m - 1) // m) * m


def _choose_lane_tile(C, HW, vmem_budget_bytes=40 * 1024 * 1024):
    """Pick the lane-tile width TN from a C-aware VMEM budget.

    Per-lane footprint estimate (sublane padding included):
      - 3 bf16 input streams, double-buffered, padded to 16 sublanes
      - ~5 live f32 (C, TN) intermediates, padded to 8 sublanes
      - bf16 (2C, TN) concat operand
      - f32 (C, TN) loss accumulator scratch
    """
    c8 = _round_up(C, 8)
    c16 = _round_up(C, 16)
    c2_16 = _round_up(2 * C, 16)
    bytes_per_lane = (
        3 * 2 * 2 * c16      # inputs: 3 streams * 2 buffers * 2B * padded rows
        + 5 * 4 * c8         # f32 intermediates
        + 2 * c2_16          # bf16 concat operand
        + 4 * c8             # f32 accumulator scratch
    )
    tn_cap = max(128, (vmem_budget_bytes // bytes_per_lane) // 128 * 128)
    tn = min(tn_cap, _round_up(HW, 128))
    return tn, bytes_per_lane


# ---------------------------------------------------------------------------
# Fused kernel:  q_sample  +  synthetic denoise_fn (single bf16 MXU dot)  +
#                lane-parallel L1(sum) accumulation.
# Grid: (batch b [parallel], HW-outer jo [parallel], HW-inner ji [arbitrary]).
# ---------------------------------------------------------------------------
def _make_kernel(C, TN, JI, HW):
    needs_mask = (HW % TN) != 0

    def kernel(
        gamma_ref,   # SMEM (B, 1) f32 : continuous_sqrt_alpha_cumprod per batch
        x_hr_ref,    # VMEM (C, TN) bf16 : x_start lane-chunk
        x_sr_ref,    # VMEM (C, TN) bf16 : conditioning (SR) lane-chunk
        noise_ref,   # VMEM (C, TN) bf16 : gaussian noise lane-chunk
        w_ref,       # VMEM (C, 2C) bf16 : full 1x1-conv weight [W_sr | W_noisy]
        bias_ref,    # VMEM (C, 1) f32   : denoiser bias
        v_ref,       # VMEM (C, 1) f32   : per-channel noise-level embedding
        loss_ref,    # VMEM (1, 1) f32   : per-(b, jo) partial L1(sum)
        acc_ref,     # VMEM (C, TN) f32  : lane-parallel loss accumulator
    ):
        b = pl.program_id(0)
        jo = pl.program_id(1)
        ji = pl.program_id(2)

        @pl.when(ji == 0)
        def _init():
            acc_ref[...] = jnp.zeros_like(acc_ref)

        gamma = gamma_ref[b, 0]                                    # scalar f32
        sroot = jnp.sqrt(1.0 - gamma * gamma)

        # f32 elementwise math (v5e VPU has no bf16); bf16 only for MXU feed.
        x_hr = x_hr_ref[...].astype(jnp.float32)                   # (C, TN)
        x_sr = x_sr_ref[...].astype(jnp.float32)                   # (C, TN)
        noise = noise_ref[...].astype(jnp.float32)                 # (C, TN)

        # q_sample: gamma * x_start + sqrt(1 - gamma^2) * noise
        x_noisy = gamma * x_hr + sroot * noise                     # (C, TN) f32

        # denoise_fn( cat([SR, x_noisy], channel), gamma ):
        # one fused bf16 MXU dot over the channel-concat (single RHS stream).
        cat = jnp.concatenate([x_sr, x_noisy], axis=0)             # (2C, TN) f32
        recon = jnp.dot(
            w_ref[...], cat.astype(jnp.bfloat16),
            preferred_element_type=jnp.float32,
        )                                                          # (C, TN) f32

        # bias + noise-level embedding folded into one (C, 1) vector.
        bvg = bias_ref[...] + v_ref[...] * gamma                   # (C, 1)

        abs_d = jnp.abs(noise - recon - bvg)                       # (C, TN)

        if needs_mask:
            # Mask lanes past the true HW extent of the (possibly partial)
            # last block so padding never contributes to the loss.
            j = jo * JI + ji
            col = jax.lax.broadcasted_iota(jnp.int32, abs_d.shape, 1)
            abs_d = jnp.where(col < (HW - j * TN), abs_d, 0.0)

        # Lane-parallel accumulation: pure VPU add per step; cross-lane
        # reduction happens once per (b, jo) segment below.
        acc_ref[...] += abs_d

        @pl.when(ji == JI - 1)
        def _finalize():
            loss_ref[...] = jnp.sum(acc_ref[...]).reshape(1, 1)

    return kernel


def gaussian_diffusion_loss(gamma, x_hr, x_sr, noise, w, bias, v):
    """gamma: (B,1); x_*: (B, C, H, W) or (B, C, HW) bf16; w: (C, 2C); bias, v: (C, 1)."""
    B, C = x_hr.shape[0], x_hr.shape[1]
    x_hr = x_hr.reshape(B, C, -1)
    x_sr = x_sr.reshape(B, C, -1)
    noise = noise.reshape(B, C, -1)
    HW = x_hr.shape[-1]
    gamma = gamma.reshape(B, 1).astype(jnp.float32)
    w_bf16 = w.astype(jnp.bfloat16)                    # MXU consumes bf16 natively

    TN, bytes_per_lane = _choose_lane_tile(C, HW)
    nj = pl.cdiv(HW, TN)

    # v7x small-batch megacore split: if only one batch element, split the HW
    # axis 2-way (only when it divides evenly -> no out-of-range block indices).
    JO = 2 if (B == 1 and nj >= 2 and nj % 2 == 0) else 1
    JI = nj // JO

    # VMEM limit: enough for the chosen tiles, capped at 48 MiB so it also fits
    # v7x's 64 MiB/TC physical VMEM with headroom (v5e/v6e have 128 MiB).
    vmem_limit = int(min(48 * 1024 * 1024,
                         max(32 * 1024 * 1024, 2 * bytes_per_lane * TN)))

    kernel = _make_kernel(C=C, TN=TN, JI=JI, HW=HW)

    def img_spec():
        return pl.BlockSpec((None, C, TN), lambda b, jo, ji: (b, 0, jo * JI + ji))

    partial = pl.pallas_call(
        kernel,
        out_shape=jax.ShapeDtypeStruct((B, JO, 1), jnp.float32),
        grid_spec=pltpu.PrefetchScalarGridSpec(
            num_scalar_prefetch=0,
            grid=(B, JO, JI),
            in_specs=[
                pl.BlockSpec(memory_space=pltpu.MemorySpace.SMEM),         # gamma
                img_spec(),                                                 # x_hr
                img_spec(),                                                 # x_sr
                img_spec(),                                                 # noise
                pl.BlockSpec((C, 2 * C), lambda b, jo, ji: (0, 0)),         # w
                pl.BlockSpec((C, 1), lambda b, jo, ji: (0, 0)),             # bias
                pl.BlockSpec((C, 1), lambda b, jo, ji: (0, 0)),             # v
            ],
            out_specs=pl.BlockSpec((None, 1, 1), lambda b, jo, ji: (b, jo, 0)),
            scratch_shapes=[pltpu.VMEM((C, TN), jnp.float32)],
        ),
        compiler_params=pltpu.CompilerParams(
            dimension_semantics=("parallel", "parallel", "arbitrary"),
            vmem_limit_bytes=vmem_limit,
        ),
    )(gamma, x_hr, x_sr, noise, w_bf16, bias, v)

    # per-(batch, outer-chunk) partial sums -> scalar (tiny host-side reduce).
    return jnp.sum(partial)


# ---------------------------------------------------------------------------
# Pure-JAX reference (literal p_losses math in f32 on the same stored inputs).
# ---------------------------------------------------------------------------
def reference_loss(gamma, x_hr, x_sr, noise, w, bias, v):
    f32 = jnp.float32
    B, C = x_hr.shape[0], x_hr.shape[1]
    x_hr = x_hr.astype(f32).reshape(B, C, -1)
    x_sr = x_sr.astype(f32).reshape(B, C, -1)
    noise = noise.astype(f32).reshape(B, C, -1)
    g = gamma.astype(f32).reshape(B, 1, 1)
    x_noisy = g * x_hr + jnp.sqrt(1.0 - g * g) * noise
    x_cat = jnp.concatenate([x_sr, x_noisy], axis=1)                # (B, 2C, HW)
    recon = jnp.einsum("ck,bkp->bcp", w.astype(f32), x_cat)
    recon = recon + bias.astype(f32)[None] + v.astype(f32)[None] * g
    return jnp.sum(jnp.abs(noise - recon))


if __name__ == "__main__":
    B, C, H, W = 2, 4, 16, 16
    n_timestep = 100

    _, _, sqrt_alphas_cumprod_prev = make_linear_schedule(n_timestep)

    key = jax.random.PRNGKey(0)
    k_t, k_g, k_hr, k_sr, k_n, k_w, k_b, k_v = jax.random.split(key, 8)

    # t ~ randint(1, num_timesteps + 1)   (deterministic via PRNGKey(0))
    t = int(jax.random.randint(k_t, (), 1, n_timestep + 1))
    lo = float(sqrt_alphas_cumprod_prev[t])        # schedule is decreasing
    hi = float(sqrt_alphas_cumprod_prev[t - 1])
    gamma = jax.random.uniform(k_g, (B, 1), dtype=jnp.float32, minval=lo, maxval=hi)

    # x_in['HR'], x_in['SR'], noise (NCHW), stored as bf16 in HBM.
    x_hr = jax.random.normal(k_hr, (B, C, H, W), jnp.float32).astype(jnp.bfloat16)
    x_sr = jax.random.normal(k_sr, (B, C, H, W), jnp.float32).astype(jnp.bfloat16)
    noise = jax.random.normal(k_n, (B, C, H, W), jnp.float32).astype(jnp.bfloat16)

    # synthetic denoise_fn parameters (1x1 conv 2C->C + bias + noise embedding);
    # weights are bf16-representable so kernel (bf16 MXU) and f32 reference agree.
    w = (0.1 * jax.random.normal(k_w, (C, 2 * C), jnp.float32)
         ).astype(jnp.bfloat16).astype(jnp.float32)
    bias = 0.01 * jax.random.normal(k_b, (C, 1), jnp.float32)
    v = 0.01 * jax.random.normal(k_v, (C, 1), jnp.float32)

    loss = gaussian_diffusion_loss(gamma, x_hr, x_sr, noise, w, bias, v)
    loss = jax.block_until_ready(loss)

    ref = reference_loss(gamma, x_hr, x_sr, noise, w, bias, v)
    np.testing.assert_allclose(np.asarray(loss), np.asarray(ref),
                               rtol=5e-4, atol=5e-2)

    print("KERNEL_OK")
</pallas_src>

<mosaic_0001>
module attributes {stable_mosaic.version = 11 : i64} {
  func.func @kernel(%arg0: i32, %arg1: i32, %arg2: i32, %arg3: memref<2x1xf32, #tpu.memory_space<smem>>, %arg4: memref<1x4x256xbf16, #tpu.memory_space<vmem>>, %arg5: memref<1x4x256xbf16, #tpu.memory_space<vmem>>, %arg6: memref<1x4x256xbf16, #tpu.memory_space<vmem>>, %arg7: memref<4x8xbf16, #tpu.memory_space<vmem>>, %arg8: memref<4x1xf32, #tpu.memory_space<vmem>>, %arg9: memref<4x1xf32, #tpu.memory_space<vmem>>, %arg10: memref<1x1x1xf32, #tpu.memory_space<vmem>>, %arg11: memref<4x256xf32, #tpu.memory_space<vmem>>) attributes {dimension_semantics = [#tpu.dimension_semantics<parallel>, #tpu.dimension_semantics<parallel>, #tpu.dimension_semantics<arbitrary>], iteration_bounds = array<i64: 2, 1, 1>, scalar_prefetch = 0 : i64, scratch_operands = 1 : i64, tpu.core_type = #tpu.core_type<tc>, window_params = [{transform_indices = @transform_0, window_bounds = array<i64: 2, 1>}, {transform_indices = @transform_1, window_bounds = array<i64: 1, 4, 256>}, {transform_indices = @transform_2, window_bounds = array<i64: 1, 4, 256>}, {transform_indices = @transform_3, window_bounds = array<i64: 1, 4, 256>}, {pipeline_mode = #tpu.pipeline_mode<synchronous>, transform_indices = @transform_4, window_bounds = array<i64: 4, 8>}, {pipeline_mode = #tpu.pipeline_mode<synchronous>, transform_indices = @transform_5, window_bounds = array<i64: 4, 1>}, {pipeline_mode = #tpu.pipeline_mode<synchronous>, transform_indices = @transform_6, window_bounds = array<i64: 4, 1>}, {transform_indices = @transform_7, window_bounds = array<i64: 1, 1, 1>}]} {
    %c0_i32 = arith.constant 0 : i32
    %0 = arith.cmpi eq, %arg2, %c0_i32 : i32
    %1 = arith.extui %0 : i1 to i32
    %c0_i32_0 = arith.constant 0 : i32
    %2 = arith.cmpi ne, %1, %c0_i32_0 : i32
    scf.if %2 {
      %cst_23 = arith.constant 0.000000e+00 : f32
      %41 = vector.broadcast %cst_23 : f32 to vector<4x256xf32>
      %c0_24 = arith.constant 0 : index
      %c0_25 = arith.constant 0 : index
      %42 = vector.load %arg11[%c0_24, %c0_25] : memref<4x256xf32, #tpu.memory_space<vmem>>, vector<4x256xf32>
      tpu.vector_store %arg11[%c0_24, %c0_25], %41 {strides = array<i32>} : memref<4x256xf32, #tpu.memory_space<vmem>>, vector<4x256xf32>,
    } else {
    }
    %3 = arith.index_cast %arg0 : i32 to index
    %c0 = arith.constant 0 : index
    %4 = memref.load %arg3[%3, %c0] : memref<2x1xf32, #tpu.memory_space<smem>>
    %5 = arith.mulf %4, %4 : f32
    %cst = arith.constant 1.000000e+00 : f32
    %6 = arith.subf %cst, %5 : f32
    %7 = math.sqrt %6 : f32
    %c0_1 = arith.constant 0 : index
    %c0_2 = arith.constant 0 : index
    %c0_3 = arith.constant 0 : index
    %8 = vector.load %arg4[%c0_1, %c0_2, %c0_3] : memref<1x4x256xbf16, #tpu.memory_space<vmem>>, vector<1x4x256xbf16>
    %9 = vector.shape_cast %8 : vector<1x4x256xbf16> to vector<4x256xbf16>
    %10 = arith.extf %9 : vector<4x256xbf16> to vector<4x256xf32>
    %c0_4 = arith.constant 0 : index
    %c0_5 = arith.constant 0 : index
    %c0_6 = arith.constant 0 : index
    %11 = vector.load %arg5[%c0_4, %c0_5, %c0_6] : memref<1x4x256xbf16, #tpu.memory_space<vmem>>, vector<1x4x256xbf16>
    %12 = vector.shape_cast %11 : vector<1x4x256xbf16> to vector<4x256xbf16>
    %13 = arith.extf %12 : vector<4x256xbf16> to vector<4x256xf32>
    %c0_7 = arith.constant 0 : index
    %c0_8 = arith.constant 0 : index
    %c0_9 = arith.constant 0 : index
    %14 = vector.load %arg6[%c0_7, %c0_8, %c0_9] : memref<1x4x256xbf16, #tpu.memory_space<vmem>>, vector<1x4x256xbf16>
    %15 = vector.shape_cast %14 : vector<1x4x256xbf16> to vector<4x256xbf16>
    %16 = arith.extf %15 : vector<4x256xbf16> to vector<4x256xf32>
    %17 = vector.broadcast %4 : f32 to vector<4x256xf32>
    %18 = arith.mulf %17, %10 : vector<4x256xf32>
    %19 = vector.broadcast %7 : f32 to vector<4x256xf32>
    %20 = arith.mulf %19, %16 : vector<4x256xf32>
    %21 = arith.addf %18, %20 : vector<4x256xf32>
    %22 = tpu.concatenate %13, %21 in 0 : vector<4x256xf32>, vector<4x256xf32> -> vector<8x256xf32>
    %c0_10 = arith.constant 0 : index
    %c0_11 = arith.constant 0 : index
    %23 = vector.load %arg7[%c0_10, %c0_11] : memref<4x8xbf16, #tpu.memory_space<vmem>>, vector<4x8xbf16>
    %24 = arith.truncf %22 : vector<8x256xf32> to vector<8x256xbf16>
    %cst_12 = arith.constant dense<0.000000e+00> : vector<4x256xf32>
    %25 = tpu.matmul %23, %24, %cst_12 {dimension_numbers = #tpu.dot_dimension_numbers<[1], [0], [0], [1], [0, 0, 1, 1], [], []>} : vector<4x8xbf16>, vector<8x256xbf16>, vector<4x256xf32> -> vector<4x256xf32>
    %c0_13 = arith.constant 0 : index
    %c0_14 = arith.constant 0 : index
    %26 = vector.load %arg8[%c0_13, %c0_14] : memref<4x1xf32, #tpu.memory_space<vmem>>, vector<4x1xf32>
    %c0_15 = arith.constant 0 : index
    %c0_16 = arith.constant 0 : index
    %27 = vector.load %arg9[%c0_15, %c0_16] : memref<4x1xf32, #tpu.memory_space<vmem>>, vector<4x1xf32>
    %28 = vector.broadcast %4 : f32 to vector<4x1xf32>
    %29 = arith.mulf %27, %28 : vector<4x1xf32>
    %30 = arith.addf %26, %29 : vector<4x1xf32>
    %31 = arith.subf %16, %25 : vector<4x256xf32>
    %32 = vector.broadcast %30 : vector<4x1xf32> to vector<4x256xf32>
    %33 = arith.subf %31, %32 : vector<4x256xf32>
    %34 = math.absf %33 : vector<4x256xf32>
    %c0_17 = arith.constant 0 : index
    %c0_18 = arith.constant 0 : index
    %35 = vector.load %arg11[%c0_17, %c0_18] : memref<4x256xf32, #tpu.memory_space<vmem>>, vector<4x256xf32>
    %36 = arith.addf %35, %34 : vector<4x256xf32>
    %c0_19 = arith.constant 0 : index
    %c0_20 = arith.constant 0 : index
    %37 = vector.load %arg11[%c0_19, %c0_20] : memref<4x256xf32, #tpu.memory_space<vmem>>, vector<4x256xf32>
    tpu.vector_store %arg11[%c0_19, %c0_20], %36 {strides = array<i32>} : memref<4x256xf32, #tpu.memory_space<vmem>>, vector<4x256xf32>,
    %c0_i32_21 = arith.constant 0 : i32
    %38 = arith.cmpi eq, %arg2, %c0_i32_21 : i32
    %39 = arith.extui %38 : i1 to i32
    %c0_i32_22 = arith.constant 0 : i32
    %40 = arith.cmpi ne, %39, %c0_i32_22 : i32
    scf.if %40 {
      %c0_23 = arith.constant 0 : index
      %c0_24 = arith.constant 0 : index
      %41 = vector.load %arg11[%c0_23, %c0_24] : memref<4x256xf32, #tpu.memory_space<vmem>>, vector<4x256xf32>
      %42 = vector.shape_cast %41 : vector<4x256xf32> to vector<1x4x256xf32>
      %cst_25 = arith.constant dense<0.000000e+00> : vector<1xf32>
      %43 = vector.multi_reduction <add>, %42, %cst_25 [1, 2] : vector<1x4x256xf32> to vector<1xf32>
      %44 = vector.shape_cast %43 : vector<1xf32> to vector<1x1x1xf32>
      %45 = vector.extract %44[0, 0, 0] : f32 from vector<1x1x1xf32>
      %46 = vector.broadcast %45 : f32 to vector<1x1xf32>
      %c0_26 = arith.constant 0 : index
      %c0_27 = arith.constant 0 : index
      %c0_28 = arith.constant 0 : index
      %47 = vector.load %arg10[%c0_26, %c0_27, %c0_28] : memref<1x1x1xf32, #tpu.memory_space<vmem>>, vector<1x1x1xf32>
      %48 = vector.shape_cast %47 : vector<1x1x1xf32> to vector<1x1xf32>
      %49 = vector.shape_cast %46 : vector<1x1xf32> to vector<1x1x1xf32>
      tpu.vector_store %arg10[%c0_26, %c0_27, %c0_28], %49 {strides = array<i32>} : memref<1x1x1xf32, #tpu.memory_space<vmem>>, vector<1x1x1xf32>,
    } else {
    }
    return
  }
  func.func @transform_0(%arg0: i32, %arg1: i32, %arg2: i32) -> (i32, i32) {
    %c0_i32 = arith.constant 0 : i32
    %c0_i32_0 = arith.constant 0 : i32
    %c0_i32_1 = arith.constant 0 : i32
    return %c0_i32, %c0_i32_0 : i32, i32
  }
  func.func @transform_1(%arg0: i32, %arg1: i32, %arg2: i32) -> (i32, i32, i32) {
    %c1_i32 = arith.constant 1 : i32
    %0 = arith.muli %arg1, %c1_i32 : i32
    %1 = arith.addi %0, %arg2 : i32
    %c0_i32 = arith.constant 0 : i32
    %c0_i32_0 = arith.constant 0 : i32
    return %arg0, %c0_i32, %1 : i32, i32, i32
  }
  func.func @transform_2(%arg0: i32, %arg1: i32, %arg2: i32) -> (i32, i32, i32) {
    %c1_i32 = arith.constant 1 : i32
    %0 = arith.muli %arg1, %c1_i32 : i32
    %1 = arith.addi %0, %arg2 : i32
    %c0_i32 = arith.constant 0 : i32
    %c0_i32_0 = arith.constant 0 : i32
    return %arg0, %c0_i32, %1 : i32, i32, i32
  }
  func.func @transform_3(%arg0: i32, %arg1: i32, %arg2: i32) -> (i32, i32, i32) {
    %c1_i32 = arith.constant 1 : i32
    %0 = arith.muli %arg1, %c1_i32 : i32
    %1 = arith.addi %0, %arg2 : i32
    %c0_i32 = arith.constant 0 : i32
    %c0_i32_0 = arith.constant 0 : i32
    return %arg0, %c0_i32, %1 : i32, i32, i32
  }
  func.func @transform_4(%arg0: i32, %arg1: i32, %arg2: i32) -> (i32, i32) {
    %c0_i32 = arith.constant 0 : i32
    %c0_i32_0 = arith.constant 0 : i32
    %c0_i32_1 = arith.constant 0 : i32
    return %c0_i32, %c0_i32_0 : i32, i32
  }
  func.func @transform_5(%arg0: i32, %arg1: i32, %arg2: i32) -> (i32, i32) {
    %c0_i32 = arith.constant 0 : i32
    %c0_i32_0 = arith.constant 0 : i32
    %c0_i32_1 = arith.constant 0 : i32
    return %c0_i32, %c0_i32_0 : i32, i32
  }
  func.func @transform_6(%arg0: i32, %arg1: i32, %arg2: i32) -> (i32, i32) {
    %c0_i32 = arith.constant 0 : i32
    %c0_i32_0 = arith.constant 0 : i32
    %c0_i32_1 = arith.constant 0 : i32
    return %c0_i32, %c0_i32_0 : i32, i32
  }
  func.func @transform_7(%arg0: i32, %arg1: i32, %arg2: i32) -> (i32, i32, i32) {
    %c0_i32 = arith.constant 0 : i32
    %c0_i32_0 = arith.constant 0 : i32
    return %arg0, %arg1, %c0_i32 : i32, i32, i32
  }
}

</mosaic_0001>

<bundles_post_ra>
// kernel: tpu_custom_call.1
= control target key start
LH: loop header
LB: loop body
LE: loop exit
PB: predicated region body
PF: predicated region fallthrough
CT: control target
= control target key end

     0   :  { %12 = vsyncpa [#allocation5], 0  ;;  %s1100_s0 = inlined_call_operand.vmem [shape: f32[2,1], index: 0, kind: input, shape index: {}]   ;;  %s1101_s1 = inlined_call_operand.vmem [shape: bf16[2,4,256], index: 1, kind: input, shape index: {}]   ;;  %s1102_s2 = inlined_call_operand.vmem [shape: bf16[2,4,256], index: 2, kind: input, shape index: {}]   ;;  %s1103_s3 = inlined_call_operand.hbm [shape: bf16[2,4,256], index: 3, kind: input, shape index: {}]   ;;  %s1104_s4 = inlined_call_operand.vmem [shape: bf16[4,8], index: 4, kind: input, shape index: {}]   ;;  %s1105_s5 = inlined_call_operand.vmem [shape: f32[4,1], index: 5, kind: input, shape index: {}]   ;;  %s1106_s6 = inlined_call_operand.vmem [shape: f32[4,1], index: 6, kind: input, shape index: {}]   ;;  %s1107_s7 = inlined_call_operand.vmem [shape: f32[2,1,1], index: 7, kind: output, shape index: {}]  }
   0x1   :  { %13 = vsyncpa [#allocation4], 0 }
   0x2   :  { %15 = vsyncpa [#allocation4 + $0x1], 0  ;;  %s943_s24 = smov 0   ;;  %s945_s25 = smov 0  }
   0x3   :  { %s947_s26 = smov 0   ;;  %s949_s27 = smov 0  }
   0x4   :  { %s951_s28 = smov 0   ;;  %s953_s29 = smov 0  }
   0x5 LB: > { %s702_s30 = sadd.s32 4294967295, %s897_s29   ;;  %p145_p0 = scmp.ne.s32.totalorder %s881_s25, %s877_s24  ;;  %s897_s29 = sphi %s953_s29, %s21_s29   ;;  %s893_s28 = sphi %s951_s28, %s1117_s28   ;;  %s889_s27 = sphi %s949_s27, %s1116_s27   ;;  %s885_s26 = sphi %s947_s26, %s1115_s26   ;;  %s881_s25 = sphi %s945_s25, %s1114_s25   ;;  %s877_s24 = sphi %s943_s24, %s1113_s24  }
   0x6   : > { %p973_p1 = scmp.eq.s32.totalorder %s702_s30, 0  ;;  %p704_p2 = scmp.ge.s32.totalorder %s897_s29, 1 }
   0x7   : > { %p247_p3 = scmp.lt.s32.totalorder %s897_s29, 3  ;;  %s260_s12 = sshll.u32 %s1100_s0, 4  ;;  %s261_s12 = int_to_ptr.vmem [resolvable:$true] %s260_s12 }
   0x8   : > { %p981_p4 = por %p973_p1, %p145_p0  ;;  %s40_s15 = sadd.s32 1, %s893_s28 }
   0x9   : > { %p988_p5 = pnand %p704_p2, %p247_p3  ;;  %s132_s16 = sadd.s32 1, %s885_s26 }
   0xa   : > { %p42_p8 = scmp.ge.s32.totalorder %s40_s15, 2  ;;  %s800_s17 = scalar_lea.vmem %s261_s12, 32 }
   0xb   : > { %p735_p6 = pneg %p988_p5  ;;  %p801_p9 = scmp.ne.s32.totalorder %s261_s12, %s800_s17 }
   0xc   : > { %p808_p13 = scmp.lt.s32.totalorder %s261_s12, %s261_s12  ;;  %p809_p0 = scmp.lt.s32.totalorder %s800_s17, %s800_s17 }
   0xd   : > { %p996_p7 = pnand %p735_p6, %p973_p1 }
   0xe   : > { %p810_p2 = por %p809_p0, %p808_p13 }
   0xf   : > { %p802_p10 = pneg %p996_p7 }
  0x11   : > { %p803_p11 = pnand %p802_p10, %p801_p9 }
  0x13   : > { %p804_p12 = pneg %p803_p11 }
  0x15   : > { %p811_p3 = pnand %p810_p2, %p804_p12 }
  0x17   : > { %814 = shalt.err (!%p811_p3)
}
  0x18   : > { %s899_s18 = smov [#allocation3]   ;;  %s1119_s15 = smov (%p42_p8, %s40_s15), 0 }
  0x19   : > { %738 = dma.vmem_to_smem (!%p996_p7), %s261_s12, 32, %s899_s18, [#allocation5]  }
  0x1a   : > { %p139_p6 = scmp.ne.s32.totalorder %s885_s26, %s881_s25  ;;  %p140_p9 = scmp.eq.s32.totalorder %s897_s29, 0 }
  0x1b   : > { %s127_s19 = ssub.s32 %s893_s28, %s1119_s15  ;;  %p744_p10 = scmp.lt.s32.totalorder %s897_s29, 2 }
  0x1c   : > { %p130_p11 = scmp.eq.s32.totalorder %s127_s19, 0  ;;  %p141_p12 = por %p140_p9, %p139_p6 }
  0x1d   : > { %s310_s20 = sand.u32 1, %s885_s26   ;;  %s722_s21 = sshll.u32 %s893_s28, 6 }
  0x1e   : > { %s1017_s22 = scalar_select %p130_p11, %s885_s26, %s132_s16  }
  0x1f   : > { %s707_s23 = sshll.u32 %s310_s20, 2  ;;  %s323_s10 = scalar_lea.hbm %s1103_s3, %s722_s21 }
  0x20   : > { %s314_s11 = scalar_lea.vmem [#allocation6], %s707_s23  ;;  %p1022_p7 = pnand %p744_p10, %p141_p12 }
  0x21   : > { %s325_s12 = sshll.u32 %s314_s11, 4  ;;  %s311_s17 = scalar_lea.sflag [#allocation4], %s310_s20  ;;  %s326_s12 = int_to_ptr.vmem [resolvable:$true] %s325_s12 }
  0x22   : > { %p817_p8 = pneg %p1022_p7  ;;  %s828_s18 = scalar_lea.vmem %s326_s12, 64 }
  0x23   : > { %p829_p13 = scmp.ne.s32.totalorder %s326_s12, %s828_s18  ;;  %s900_s16 = smov [#allocation6]  }
  0x24   : > { %s833_s19 = sshll.u32 %s900_s16, 4  ;;  %s834_s19 = int_to_ptr.vmem [resolvable:$false] %s833_s19 }
  0x25   : > { %p831_p0 = pnand %p829_p13, %p817_p8  ;;  %s835_s24 = scalar_lea.vmem %s834_s19, 128 }
  0x26   : > { %p836_p3 = scmp.lt.s32.totalorder %s326_s12, %s834_s19  ;;  %p837_p6 = scmp.lt.s32.totalorder %s835_s24, %s828_s18 }
  0x27   : > { %p832_p2 = pneg %p831_p0 }
  0x28   : > { %p838_p9 = por %p837_p6, %p836_p3 }
  0x2a   : > { %p839_p10 = pnand %p838_p9, %p832_p2 }
  0x2c   : > { %842 = shalt.err (!%p839_p10)
}
  0x2d   : > { %742 = dma.hbm_to_vmem [thread:$0]  (!%p1022_p7), %s323_s10, 64, %s326_s12, %s311_s17  }
  0x2e   : > { %334 = sbr.rel (%p988_p5) target bundleno = 562 (0x232), region = 48 }
  0x33   : > { %868 = dma.done.wait (%p973_p1), [#allocation5], 32  }
  0x34   : > { %870 = vsyncadd (%p973_p1), [#allocation5], 4294967264  ;;  %s340_s20 = sand.u32 1, %s881_s25  }
  0x35   : > { %s1037_s21 = sshll.u32 %s340_s20, 2  ;;  %s341_s23 = scalar_lea.sflag [#allocation4], %s340_s20 }
  0x36   : > { %s344_s30 = scalar_lea.vmem [#allocation6], %s1037_s21 }
  0x37   : > { %872 = dma.done.wait (%p981_p4), %s341_s23, 64  }
  0x38   : > { %874 = vsyncadd (%p981_p4), %s341_s23, 4294967232 }
  0x39   : > { %349 = sfence }
  0x3a   : > { %s717_s13 = sshll.u32 %s889_s27, 7  ;;  %v901_v0 = vmov 0   ;;  %v523_v1 = vld [vmem:[%s1106_s6] sm:$0xf]  ;;  %p399_p1 = scmp.lt.s32.totalorder %s889_s27, 1  ;;  %vm465_vm2 = vcmask 1043456   ;;  %v538_v32 = vlaneseq }
  0x3b   : > { %s1045_s10 = sld [smem:[#allocation3 + %s717_s13]]  ;;  %513 = vmatprep.mubr.bf16.mxu0 %v901_v0  ;;  %797 = vset.pattern.permute.xlu0 %v901_v0  ;;  %v522_v3 = vld [vmem:[%s1105_s5] sm:$0xf]  ;;  %v452_v13 = vld [vmem:[%s344_s30] sm:$0xf]  ;;  %vm471_vm3 = vcmask 64512  }
  0x3c   : > { %s1121_s27 = smov (!%p399_p1, %s889_s27), 1  ;;  %v453_v16 = vunpack.c.l.bf16 %v452_v13  ;;  %v468_v29 = vld [vmem:[%s1104_s4] sm:$0x3]  ;;  %v902_v30 = vmov 839922192   ;;  %v539_v34 = vshrl.u32 %v538_v32, 7 }
  0x3d   : > { %s723_s18 = sshll.u32 %s1121_s27, 2  ;;  %v536_v31 = vunpack.c.l.s4 %v902_v30  ;;  %vm568_vm4 = vcmask 0  }
  0x3e   : > { %s406_s24 = scalar_lea.vmem %s1101_s1, %s723_s18  ;;  %s418_s13 = scalar_lea.vmem %s1102_s2, %s723_s18 }
  0x3f   : > { %v448_v12 = vld [vmem:[%s406_s24] sm:$0xf]  ;;  %v537_v33 = vunpack.c.0.s8 %v536_v31 }
  0x40   : > { %v450_v14 = vld [vmem:[%s418_s13] sm:$0xf]  ;;  %v449_v15 = vunpack.c.l.bf16 %v448_v12 }
  0x41   : > { %s437_s12 = smul.f32 %s1045_s10, %s1045_s10  ;;  %v454_v2 = vstv %s1045_s10  ;;  %v451_v17 = vunpack.c.l.bf16 %v450_v14  ;;  %v540_v35 = vsub.s32 %v537_v33, %v539_v34 }
  0x42   : > { %v524_v4 = vmul.f32 %v523_v1, %v454_v2  ;;  %v455_v18 = vmul.f32 %v454_v2, %v449_v15 }
  0x43   : > { %s438_s17 = ssub.f32 1.0, %s437_s12  ;;  %v460_v21 = vcombine.high %v451_v17, %v451_v17  ;;  %s428_s12 = scalar_lea.vmem %s1107_s7, %s1121_s27 }
  0x44   : > { %v525_v5 = vadd.f32 %v524_v4, %v522_v3 }
  0x45   : > { %v439_v6 = vstv %s438_s17 }
  0x46   : > { %798 = vrsqrt.f32 %v439_v6  ;;  %533 = vperm.xlu0 %797, %v525_v5   ;;  %vm442_vm0 = vcmp.eq.f32.partialorder %v439_v6, inf  ;;  %v445_v8 = vand.u32 2147483648, %v439_v6  ;;  %vm444_vm1 = vcmp.eq.f32.partialorder %v439_v6, 0.0 }
  0x53   : > { %v799_v7 = vpop.eup %798 }
  0x54   : > { %v441_v9 = vmul.f32 %v799_v7, %v439_v6 }
  0x56   : > { %v443_v10 = vsel %vm442_vm0, %v439_v6, %v441_v9 }
  0x57   : > { %v446_v11 = vsel %vm444_vm1, %v445_v8, %v443_v10 }
  0x58   : > { %725 = vpush %v446_v11 }
  0x89   : > { %s726_s10 = spop %725 }
  0x8a   : > { %v456_v19 = vstv %s726_s10 }
  0x8b   : > { %v457_v20 = vmul.f32 %v456_v19, %v453_v16 }
  0x8d   : > { %v458_v22 = vadd.f32 %v457_v20, %v455_v18 }
  0x8f   : > { %v463_v23 = vcombine.low %v458_v22, %v458_v22  ;;  %v467_v24 = vsel %vm465_vm2, %v460_v21, %v458_v22 }
  0x90   : > { %v470_v25 = vpack.c.bf16 %v467_v24, %v467_v24 }
  0x91   : > { %v466_v26 = vsel %vm465_vm2, %v451_v17, %v463_v23 }
  0x92   : > { %718 = vmatprep.subr.msk.bf16.mxu0 %vm465_vm2, %v470_v25  ;;  %v469_v27 = vpack.c.bf16 %v466_v26, %v466_v26 }
  0x94   : > { %v476_v28 = vsel %vm465_vm2, %v469_v27, 0 }
  0x95   : > { %496 = vmatpush1.bf16.msra.mxu0 %v476_v28 }
  0x98   : > { %719 = vmatmul.mubr.msk.bf16.vlgmr.msra.gmra.mxu0 %vm471_vm3, %v468_v29 }
  0xc1   : > { %v534_v37 = vpop.permute.xlu0 %533 }
  0xc2   : > { %v541_v40 = vrot.slane %v534_v37, %v540_v35 }
 0x158   : > { %v515_v36 = vpop.f32.mrf.mxu0 }
 0x15a   : > { %v517_v38 = vpop.f32.mrf.mxu0 }
 0x15b   : > { %v528_v39 = vcombine.low %v515_v36, %v517_v38 }
 0x15c   : > { %v519_v41 = vpop.f32.mrf.mxu0 }
 0x15d   : > { %v530_v42 = vsub.f32 %v453_v16, %v528_v39 }
 0x15e   : > { %v520_v43 = vpop.f32.mrf.mxu0 }
 0x15f   : > { %v543_v44 = vsub.f32 %v530_v42, %v541_v40 }
 0x161   : > { %v544_v45 = vand.u32 2147483647, %v543_v44 }
 0x163   : > { %v553_v46 = vcombine.high %v544_v45, %v544_v45  ;;  %v555_v47 = vsel %vm465_vm2, %v544_v45, 0.0 }
 0x165   : > { %v556_v48 = vsel %vm465_vm2, %v553_v46, 0.0 }
 0x166   : > { %v557_v49 = vadd.f32 %v556_v48, %v555_v47 }
 0x168   : > { %558 = vadd.xlane.f32.xlu0 %v557_v49 }
 0x1f1   : > { %v559_v50 = vpop.xlane.xlu0 %558 }
 0x1f2   : > { %v560_v51 = vrot.slane %v559_v50, 4 }
 0x1f4   : > { %v561_v52 = vadd.f32 %v560_v51, %v559_v50 }
 0x1f6   : > { %v562_v53 = vrot.slane %v561_v52, 2 }
 0x1f8   : > { %v563_v54 = vadd.f32 %v562_v53, %v561_v52 }
 0x1fa   : > { %v564_v55 = vrot.slane %v563_v54, 1 }
 0x1fc   : > { %v565_v56 = vadd.f32 %v564_v55, %v563_v54 }
 0x1fe   : > { %727 = vpush %v565_v56 }
 0x22f   : > { %s728_s14 = spop %727 }
 0x230   : > { %v567_v57 = vstv %s728_s14 }
 0x231   : > { %569 = vst.msk [vmem:[%s428_s12] sm:$0x1] %vm568_vm4, %v567_v57 }
 0x232 PF: > { %s21_s29 = sadd.s32 1, %s897_s29   ;;  %s1113_s24 = smov %s881_s25 }
 0x233   : > { %p18_p4 = scmp.ge.s32.totalorder %s21_s29, 4   ;;  %s1114_s25 = smov %s885_s26 }
 0x234   : > { %s1115_s26 = smov %s1017_s22  ;;  %s1116_s27 = smov %s893_s28 }
 0x235   : > { %s1117_s28 = smov %s1119_s15  ;;  %20 = sbr.rel (!%p18_p4) target bundleno = 5 (0x5), region = 107 }
 0x23a   :  { %593 = vsyncpa [#allocation4], 1 }
 0x23b   :  { %595 = vsyncpa [#allocation4 + $0x1], 1 }
 0x23c   :  { %596 = vsyncpa [#allocation5], 1 }
 0x23d   :  { %598 = vsyncpa [#allocation5 + $0x1], 1 }

</bundles_post_ra>
